<compile_context>
chip_gen: v5e
topology: v5e:2x2
jax: 0.10.0
libtpu: 0.0.40
codegen_flags: <defaults>
</compile_context>

<pallas_src>
import jax
import jax.numpy as jnp
from jax.experimental import pallas as pl
from jax.experimental.pallas import tpu as pltpu


def _round_up(x, m):
    return ((x + m - 1) // m) * m


def _vmem_limit_bytes(est_bytes):
    """Per-call VMEM limit: estimate (with margin), capped at 3/4 of physical VMEM."""
    phys = 64 * 2 ** 20
    try:
        info_fn = getattr(pltpu, "get_tpu_info", None)
        if info_fn is not None:
            phys = int(getattr(info_fn(), "vmem_capacity_bytes", phys))
    except Exception:
        pass
    cap = (phys * 3) // 4               # ~48 MiB on v7x (64), ~96 MiB on v5e/v6e (128)
    return int(min(max(int(est_bytes * 1.5), 16 * 2 ** 20), cap))


def conv_bn_relu(x_nchw, weight, bias, gamma, beta, *, no_bn=False, eps=1e-5,
                 compute_dtype=jnp.bfloat16, out_dtype=None):
    """x_nchw: (N, C_in, H, W); weight: (C_out, C_in, KH, KW); bias/gamma/beta: (C_out,)."""
    n, c_in, h, w = x_nchw.shape
    c_out, c_in_w, kh, kw = weight.shape
    assert c_in == c_in_w, (c_in, c_in_w)
    oh, ow = h - kh + 1, w - kw + 1
    ohw = oh * w                          # "wide" per-sample output columns (last kw-1 of each row are garbage)
    out_dtype = x_nchw.dtype if out_dtype is None else out_dtype

    c_pad = _round_up(c_out, 8)           # matmul M (sublane) dim
    l_in = _round_up(h * w + kw - 1, 128)  # flat spatial length incl. max tap shift

    # Channels-major flattened input (free reshape); cast to the MXU operand dtype and
    # pad for the tap shifts — the only wrapper pass over the (small, un-blown-up) input.
    x_flat = jnp.pad(x_nchw.reshape(n, c_in, h * w).astype(compute_dtype),
                     ((0, 0), (0, 0), (0, l_in - h * w)))

    # Per-tap weights: w_taps[i*kw + j] == weight[:, :, i, j], zero-padded to c_pad rows.
    w_taps = weight.transpose(2, 3, 0, 1).reshape(kh * kw, c_out, c_in)
    w_taps = jnp.pad(w_taps, ((0, 0), (0, c_pad - c_out), (0, 0))).astype(compute_dtype)

    inv_cnt = 1.0 / float(oh * ow)

    # ---------------- in-kernel fused "im2col": per-tap MXU accumulation ----------------
    def _conv_acc(x_ref, w_ref):
        acc = None
        for t in range(kh * kw):
            i, j = divmod(t, kw)
            s = i * w + j                                      # static shift
            d = jnp.dot(w_ref[t], x_ref[0, :, s:s + ohw],
                        preferred_element_type=jnp.float32)    # (c_pad, OH*W), f32 acc
            acc = d if acc is None else acc + d
        return acc

    def _valid_mask():
        # column q -> (oh=q//W, ow=q%W); columns with ow >= OW are garbage.
        q = jax.lax.broadcasted_iota(jnp.int32, (1, ohw), 1)
        return (q % w) < ow

    # ---------------- Sweep 1 (BN path): per-sample Welford partials ---------------------
    def _stats_kernel(x_ref, w_ref, mean_ref, m2_ref):
        acc = _conv_acc(x_ref, w_ref)
        valid = _valid_mask()
        s = jnp.sum(jnp.where(valid, acc, 0.0), axis=1, keepdims=True)   # (c_pad, 1)
        mean_t = s * inv_cnt
        diff = jnp.where(valid, acc - mean_t, 0.0)
        m2_t = jnp.sum(diff * diff, axis=1, keepdims=True)
        mean_ref[...] = mean_t[None]
        m2_ref[...] = m2_t[None]

    # ---------------- Sweep 2 (BN path): recompute conv + folded scale/shift + ReLU ------
    def _bn_relu_kernel(x_ref, w_ref, scale_ref, shift_ref, out_ref):
        acc = _conv_acc(x_ref, w_ref)
        y = jnp.maximum(acc * scale_ref[...] + shift_ref[...], 0.0)
        out_ref[...] = y[:c_out, :][None].astype(out_ref.dtype)

    # ---------------- Single sweep (no_bn path): conv + bias + ReLU ----------------------
    def _conv_bias_relu_kernel(x_ref, w_ref, bias_ref, out_ref):
        acc = _conv_acc(x_ref, w_ref)
        y = jnp.maximum(acc + bias_ref[...], 0.0)
        out_ref[...] = y[:c_out, :][None].astype(out_ref.dtype)

    x_spec = pl.BlockSpec((1, c_in, l_in), lambda b: (b, 0, 0))
    w_spec = pl.BlockSpec((kh * kw, c_pad, c_in), lambda b: (0, 0, 0))   # resident across grid
    col_spec = pl.BlockSpec((c_pad, 1), lambda b: (0, 0))                # resident per-channel column
    stat_spec = pl.BlockSpec((1, c_pad, 1), lambda b: (b, 0, 0))
    out_spec = pl.BlockSpec((1, c_out, ohw), lambda b: (b, 0, 0))

    itemsize = jnp.dtype(compute_dtype).itemsize
    est = (2 * _round_up(c_in, 8) * l_in * itemsize                      # double-buffered input block
           + kh * kw * c_pad * 128 * itemsize                            # resident per-tap weights
           + c_pad * _round_up(ohw, 128) * 4                             # f32 accumulator
           + 2 * c_pad * _round_up(ohw, 128) * jnp.dtype(out_dtype).itemsize  # double-buffered output
           + 512 * 1024)
    cparams = pltpu.CompilerParams(dimension_semantics=("parallel",),
                                   vmem_limit_bytes=_vmem_limit_bytes(est))

    if no_bn:
        bias_col = jnp.pad(bias.astype(jnp.float32).reshape(c_out, 1),
                           ((0, c_pad - c_out), (0, 0)))
        out_wide = pl.pallas_call(
            _conv_bias_relu_kernel,
            grid=(n,),
            in_specs=[x_spec, w_spec, col_spec],
            out_specs=out_spec,
            out_shape=jax.ShapeDtypeStruct((n, c_out, ohw), out_dtype),
            compiler_params=cparams,
        )(x_flat, w_taps, bias_col)
    else:
        # Sweep 1: tiny per-sample stats only (conv bias skipped: cancelled by BN mean).
        mean_p, m2_p = pl.pallas_call(
            _stats_kernel,
            grid=(n,),
            in_specs=[x_spec, w_spec],
            out_specs=(stat_spec, stat_spec),
            out_shape=(jax.ShapeDtypeStruct((n, c_pad, 1), jnp.float32),
                       jax.ShapeDtypeStruct((n, c_pad, 1), jnp.float32)),
            compiler_params=cparams,
        )(x_flat, w_taps)

        # Tiny O(N*C_out) Welford combine + BN fold in plain JAX (equal per-tile counts;
        # zero-weight padded channels give mean=var=0 and are never stored).
        means = mean_p[:, :, 0]                                   # (N, c_pad)
        m2s = m2_p[:, :, 0]
        grand_mean = jnp.mean(means, axis=0)
        m2 = jnp.sum(m2s, axis=0) + float(oh * ow) * jnp.sum((means - grand_mean) ** 2, axis=0)
        var = m2 / float(n * oh * ow)                             # biased var (PyTorch BN forward)
        gamma_p = jnp.pad(gamma.astype(jnp.float32), (0, c_pad - c_out))
        beta_p = jnp.pad(beta.astype(jnp.float32), (0, c_pad - c_out))
        scale = gamma_p * jax.lax.rsqrt(var + eps)
        shift = beta_p - grand_mean * scale

        # Sweep 2: recompute the conv (cheaper than storing/re-reading a c_pad-wide
        # intermediate) and write relu(conv*scale + shift) for the real c_out channels.
        out_wide = pl.pallas_call(
            _bn_relu_kernel,
            grid=(n,),
            in_specs=[x_spec, w_spec, col_spec, col_spec],
            out_specs=out_spec,
            out_shape=jax.ShapeDtypeStruct((n, c_out, ohw), out_dtype),
            compiler_params=cparams,
        )(x_flat, w_taps, scale.reshape(c_pad, 1), shift.reshape(c_pad, 1))

    # Channels-major already matches NCHW: reshape (free) and drop the KW-1 garbage
    # columns of each output row.  No transpose, no c_pad-wide slice.
    return out_wide.reshape(n, c_out, oh, w)[..., :ow]


def _reference(x, weight, bias, gamma, beta, *, no_bn=False, eps=1e-5):
    y = jax.lax.conv_general_dilated(
        x, weight, window_strides=(1, 1), padding="VALID",
        dimension_numbers=("NCHW", "OIHW", "NCHW"))
    y = y + bias.reshape(1, -1, 1, 1)
    if not no_bn:
        mean = jnp.mean(y, axis=(0, 2, 3), keepdims=True)
        var = jnp.mean((y - mean) ** 2, axis=(0, 2, 3), keepdims=True)
        y = (y - mean) * jax.lax.rsqrt(var + eps)
        y = y * gamma.reshape(1, -1, 1, 1) + beta.reshape(1, -1, 1, 1)
    return jnp.maximum(y, 0.0)


if __name__ == "__main__":
    key = jax.random.PRNGKey(0)
    k_x, k_w, k_b, k_g, k_bt = jax.random.split(key, 5)

    N, C_IN, H, W = 2, 4, 16, 16
    C_OUT, KSIZE = 8, 3
    OH, OW = H - KSIZE + 1, W - KSIZE + 1

    x = jax.random.normal(k_x, (N, C_IN, H, W), dtype=jnp.float32)
    weight = jax.random.normal(k_w, (C_OUT, C_IN, KSIZE, KSIZE), dtype=jnp.float32) * 0.1
    bias = jax.random.normal(k_b, (C_OUT,), dtype=jnp.float32) * 0.1
    gamma = 1.0 + 0.1 * jax.random.normal(k_g, (C_OUT,), dtype=jnp.float32)
    beta = 0.1 * jax.random.normal(k_bt, (C_OUT,), dtype=jnp.float32)

    ref = _reference(x, weight, bias, gamma, beta, no_bn=False)
    ref_nobn = _reference(x, weight, bias, gamma, beta, no_bn=True)

    # f32 MXU operands: tight check against the f32 reference (BN and no-BN paths).
    out_f32 = jax.block_until_ready(
        conv_bn_relu(x, weight, bias, gamma, beta, no_bn=False,
                     compute_dtype=jnp.float32))
    assert out_f32.shape == (N, C_OUT, OH, OW), out_f32.shape
    assert jnp.allclose(out_f32, ref, atol=1e-4, rtol=1e-4), \
        float(jnp.max(jnp.abs(out_f32 - ref)))

    out_nobn = jax.block_until_ready(
        conv_bn_relu(x, weight, bias, gamma, beta, no_bn=True,
                     compute_dtype=jnp.float32))
    assert jnp.allclose(out_nobn, ref_nobn, atol=1e-4, rtol=1e-4), \
        float(jnp.max(jnp.abs(out_nobn - ref_nobn)))

    # bf16 MXU operands (default perf path): loose check against the f32 reference.
    out_bf16 = jax.block_until_ready(
        conv_bn_relu(x, weight, bias, gamma, beta, no_bn=False))
    assert out_bf16.shape == (N, C_OUT, OH, OW), out_bf16.shape
    assert jnp.allclose(out_bf16, ref, atol=1e-1, rtol=1e-1), \
        float(jnp.max(jnp.abs(out_bf16 - ref)))

    print("KERNEL_OK")
</pallas_src>

<mosaic_0001>
module attributes {stable_mosaic.version = 11 : i64} {
  func.func @_stats_kernel(%arg0: i32, %arg1: memref<1x4x384xf32, #tpu.memory_space<vmem>>, %arg2: memref<9x8x4xf32, #tpu.memory_space<vmem>>, %arg3: memref<1x8x1xf32, #tpu.memory_space<vmem>>, %arg4: memref<1x8x1xf32, #tpu.memory_space<vmem>>) attributes {dimension_semantics = [#tpu.dimension_semantics<parallel>], iteration_bounds = array<i64: 2>, scalar_prefetch = 0 : i64, scratch_operands = 0 : i64, tpu.core_type = #tpu.core_type<tc>, window_params = [{transform_indices = @transform_0, window_bounds = array<i64: 1, 4, 384>}, {pipeline_mode = #tpu.pipeline_mode<synchronous>, transform_indices = @transform_1, window_bounds = array<i64: 9, 8, 4>}, {transform_indices = @transform_2, window_bounds = array<i64: 1, 8, 1>}, {transform_indices = @transform_3, window_bounds = array<i64: 1, 8, 1>}]} {
    %c0 = arith.constant 0 : index
    %c0_0 = arith.constant 0 : index
    %c0_1 = arith.constant 0 : index
    %0 = vector.load %arg2[%c0, %c0_0, %c0_1] : memref<9x8x4xf32, #tpu.memory_space<vmem>>, vector<1x8x4xf32>
    %1 = vector.shape_cast %0 : vector<1x8x4xf32> to vector<8x4xf32>
    %c0_2 = arith.constant 0 : index
    %c0_3 = arith.constant 0 : index
    %c0_4 = arith.constant 0 : index
    %2 = vector.load %arg1[%c0_2, %c0_3, %c0_4] : memref<1x4x384xf32, #tpu.memory_space<vmem>>, vector<1x4x224xf32>
    %3 = vector.shape_cast %2 : vector<1x4x224xf32> to vector<4x224xf32>
    %cst = arith.constant dense<0.000000e+00> : vector<8x224xf32>
    %4 = tpu.matmul %1, %3, %cst {dimension_numbers = #tpu.dot_dimension_numbers<[1], [0], [0], [1], [0, 0, 1, 1], [], []>} : vector<8x4xf32>, vector<4x224xf32>, vector<8x224xf32> -> vector<8x224xf32>
    %c1 = arith.constant 1 : index
    %c0_5 = arith.constant 0 : index
    %c0_6 = arith.constant 0 : index
    %5 = vector.load %arg2[%c1, %c0_5, %c0_6] : memref<9x8x4xf32, #tpu.memory_space<vmem>>, vector<1x8x4xf32>
    %6 = vector.shape_cast %5 : vector<1x8x4xf32> to vector<8x4xf32>
    %c0_7 = arith.constant 0 : index
    %c0_8 = arith.constant 0 : index
    %c1_9 = arith.constant 1 : index
    %7 = vector.load %arg1[%c0_7, %c0_8, %c1_9] : memref<1x4x384xf32, #tpu.memory_space<vmem>>, vector<1x4x224xf32>
    %8 = vector.shape_cast %7 : vector<1x4x224xf32> to vector<4x224xf32>
    %cst_10 = arith.constant dense<0.000000e+00> : vector<8x224xf32>
    %9 = tpu.matmul %6, %8, %cst_10 {dimension_numbers = #tpu.dot_dimension_numbers<[1], [0], [0], [1], [0, 0, 1, 1], [], []>} : vector<8x4xf32>, vector<4x224xf32>, vector<8x224xf32> -> vector<8x224xf32>
    %10 = arith.addf %4, %9 : vector<8x224xf32>
    %c2 = arith.constant 2 : index
    %c0_11 = arith.constant 0 : index
    %c0_12 = arith.constant 0 : index
    %11 = vector.load %arg2[%c2, %c0_11, %c0_12] : memref<9x8x4xf32, #tpu.memory_space<vmem>>, vector<1x8x4xf32>
    %12 = vector.shape_cast %11 : vector<1x8x4xf32> to vector<8x4xf32>
    %c0_13 = arith.constant 0 : index
    %c0_14 = arith.constant 0 : index
    %c2_15 = arith.constant 2 : index
    %13 = vector.load %arg1[%c0_13, %c0_14, %c2_15] : memref<1x4x384xf32, #tpu.memory_space<vmem>>, vector<1x4x224xf32>
    %14 = vector.shape_cast %13 : vector<1x4x224xf32> to vector<4x224xf32>
    %cst_16 = arith.constant dense<0.000000e+00> : vector<8x224xf32>
    %15 = tpu.matmul %12, %14, %cst_16 {dimension_numbers = #tpu.dot_dimension_numbers<[1], [0], [0], [1], [0, 0, 1, 1], [], []>} : vector<8x4xf32>, vector<4x224xf32>, vector<8x224xf32> -> vector<8x224xf32>
    %16 = arith.addf %10, %15 : vector<8x224xf32>
    %c3 = arith.constant 3 : index
    %c0_17 = arith.constant 0 : index
    %c0_18 = arith.constant 0 : index
    %17 = vector.load %arg2[%c3, %c0_17, %c0_18] : memref<9x8x4xf32, #tpu.memory_space<vmem>>, vector<1x8x4xf32>
    %18 = vector.shape_cast %17 : vector<1x8x4xf32> to vector<8x4xf32>
    %c0_19 = arith.constant 0 : index
    %c0_20 = arith.constant 0 : index
    %c16 = arith.constant 16 : index
    %19 = vector.load %arg1[%c0_19, %c0_20, %c16] : memref<1x4x384xf32, #tpu.memory_space<vmem>>, vector<1x4x224xf32>
    %20 = vector.shape_cast %19 : vector<1x4x224xf32> to vector<4x224xf32>
    %cst_21 = arith.constant dense<0.000000e+00> : vector<8x224xf32>
    %21 = tpu.matmul %18, %20, %cst_21 {dimension_numbers = #tpu.dot_dimension_numbers<[1], [0], [0], [1], [0, 0, 1, 1], [], []>} : vector<8x4xf32>, vector<4x224xf32>, vector<8x224xf32> -> vector<8x224xf32>
    %22 = arith.addf %16, %21 : vector<8x224xf32>
    %c4 = arith.constant 4 : index
    %c0_22 = arith.constant 0 : index
    %c0_23 = arith.constant 0 : index
    %23 = vector.load %arg2[%c4, %c0_22, %c0_23] : memref<9x8x4xf32, #tpu.memory_space<vmem>>, vector<1x8x4xf32>
    %24 = vector.shape_cast %23 : vector<1x8x4xf32> to vector<8x4xf32>
    %c0_24 = arith.constant 0 : index
    %c0_25 = arith.constant 0 : index
    %c17 = arith.constant 17 : index
    %25 = vector.load %arg1[%c0_24, %c0_25, %c17] : memref<1x4x384xf32, #tpu.memory_space<vmem>>, vector<1x4x224xf32>
    %26 = vector.shape_cast %25 : vector<1x4x224xf32> to vector<4x224xf32>
    %cst_26 = arith.constant dense<0.000000e+00> : vector<8x224xf32>
    %27 = tpu.matmul %24, %26, %cst_26 {dimension_numbers = #tpu.dot_dimension_numbers<[1], [0], [0], [1], [0, 0, 1, 1], [], []>} : vector<8x4xf32>, vector<4x224xf32>, vector<8x224xf32> -> vector<8x224xf32>
    %28 = arith.addf %22, %27 : vector<8x224xf32>
    %c5 = arith.constant 5 : index
    %c0_27 = arith.constant 0 : index
    %c0_28 = arith.constant 0 : index
    %29 = vector.load %arg2[%c5, %c0_27, %c0_28] : memref<9x8x4xf32, #tpu.memory_space<vmem>>, vector<1x8x4xf32>
    %30 = vector.shape_cast %29 : vector<1x8x4xf32> to vector<8x4xf32>
    %c0_29 = arith.constant 0 : index
    %c0_30 = arith.constant 0 : index
    %c18 = arith.constant 18 : index
    %31 = vector.load %arg1[%c0_29, %c0_30, %c18] : memref<1x4x384xf32, #tpu.memory_space<vmem>>, vector<1x4x224xf32>
    %32 = vector.shape_cast %31 : vector<1x4x224xf32> to vector<4x224xf32>
    %cst_31 = arith.constant dense<0.000000e+00> : vector<8x224xf32>
    %33 = tpu.matmul %30, %32, %cst_31 {dimension_numbers = #tpu.dot_dimension_numbers<[1], [0], [0], [1], [0, 0, 1, 1], [], []>} : vector<8x4xf32>, vector<4x224xf32>, vector<8x224xf32> -> vector<8x224xf32>
    %34 = arith.addf %28, %33 : vector<8x224xf32>
    %c6 = arith.constant 6 : index
    %c0_32 = arith.constant 0 : index
    %c0_33 = arith.constant 0 : index
    %35 = vector.load %arg2[%c6, %c0_32, %c0_33] : memref<9x8x4xf32, #tpu.memory_space<vmem>>, vector<1x8x4xf32>
    %36 = vector.shape_cast %35 : vector<1x8x4xf32> to vector<8x4xf32>
    %c0_34 = arith.constant 0 : index
    %c0_35 = arith.constant 0 : index
    %c32 = arith.constant 32 : index
    %37 = vector.load %arg1[%c0_34, %c0_35, %c32] : memref<1x4x384xf32, #tpu.memory_space<vmem>>, vector<1x4x224xf32>
    %38 = vector.shape_cast %37 : vector<1x4x224xf32> to vector<4x224xf32>
    %cst_36 = arith.constant dense<0.000000e+00> : vector<8x224xf32>
    %39 = tpu.matmul %36, %38, %cst_36 {dimension_numbers = #tpu.dot_dimension_numbers<[1], [0], [0], [1], [0, 0, 1, 1], [], []>} : vector<8x4xf32>, vector<4x224xf32>, vector<8x224xf32> -> vector<8x224xf32>
    %40 = arith.addf %34, %39 : vector<8x224xf32>
    %c7 = arith.constant 7 : index
    %c0_37 = arith.constant 0 : index
    %c0_38 = arith.constant 0 : index
    %41 = vector.load %arg2[%c7, %c0_37, %c0_38] : memref<9x8x4xf32, #tpu.memory_space<vmem>>, vector<1x8x4xf32>
    %42 = vector.shape_cast %41 : vector<1x8x4xf32> to vector<8x4xf32>
    %c0_39 = arith.constant 0 : index
    %c0_40 = arith.constant 0 : index
    %c33 = arith.constant 33 : index
    %43 = vector.load %arg1[%c0_39, %c0_40, %c33] : memref<1x4x384xf32, #tpu.memory_space<vmem>>, vector<1x4x224xf32>
    %44 = vector.shape_cast %43 : vector<1x4x224xf32> to vector<4x224xf32>
    %cst_41 = arith.constant dense<0.000000e+00> : vector<8x224xf32>
    %45 = tpu.matmul %42, %44, %cst_41 {dimension_numbers = #tpu.dot_dimension_numbers<[1], [0], [0], [1], [0, 0, 1, 1], [], []>} : vector<8x4xf32>, vector<4x224xf32>, vector<8x224xf32> -> vector<8x224xf32>
    %46 = arith.addf %40, %45 : vector<8x224xf32>
    %c8 = arith.constant 8 : index
    %c0_42 = arith.constant 0 : index
    %c0_43 = arith.constant 0 : index
    %47 = vector.load %arg2[%c8, %c0_42, %c0_43] : memref<9x8x4xf32, #tpu.memory_space<vmem>>, vector<1x8x4xf32>
    %48 = vector.shape_cast %47 : vector<1x8x4xf32> to vector<8x4xf32>
    %c0_44 = arith.constant 0 : index
    %c0_45 = arith.constant 0 : index
    %c34 = arith.constant 34 : index
    %49 = vector.load %arg1[%c0_44, %c0_45, %c34] : memref<1x4x384xf32, #tpu.memory_space<vmem>>, vector<1x4x224xf32>
    %50 = vector.shape_cast %49 : vector<1x4x224xf32> to vector<4x224xf32>
    %cst_46 = arith.constant dense<0.000000e+00> : vector<8x224xf32>
    %51 = tpu.matmul %48, %50, %cst_46 {dimension_numbers = #tpu.dot_dimension_numbers<[1], [0], [0], [1], [0, 0, 1, 1], [], []>} : vector<8x4xf32>, vector<4x224xf32>, vector<8x224xf32> -> vector<8x224xf32>
    %52 = arith.addf %46, %51 : vector<8x224xf32>
    %53 = tpu.iota {dimensions = array<i32: 1>} : vector<1x224xi32>
    %c16_i32 = arith.constant 16 : i32
    %c0_i32 = arith.constant 0 : i32
    %54 = arith.cmpi eq, %c16_i32, %c0_i32 : i32
    %c1_i32 = arith.constant 1 : i32
    %55 = arith.select %54, %c1_i32, %c16_i32 : i32
    %56 = vector.broadcast %55 : i32 to vector<1x224xi32>
    %57 = arith.remsi %53, %56 : vector<1x224xi32>
    %c0_i32_47 = arith.constant 0 : i32
    %58 = vector.broadcast %c0_i32_47 : i32 to vector<1x224xi32>
    %59 = arith.cmpi ne, %57, %58 : vector<1x224xi32>
    %c0_i32_48 = arith.constant 0 : i32
    %60 = vector.broadcast %c0_i32_48 : i32 to vector<1x224xi32>
    %61 = arith.cmpi slt, %57, %60 : vector<1x224xi32>
    %c0_i32_49 = arith.constant 0 : i32
    %62 = arith.cmpi slt, %55, %c0_i32_49 : i32
    %63 = vector.broadcast %62 : i1 to vector<1x224xi1>
    %64 = vector.broadcast %63 : vector<1x224xi1> to vector<1x224xi1>
    %65 = arith.xori %61, %64 : vector<1x224xi1>
    %66 = arith.andi %65, %59 : vector<1x224xi1>
    %67 = vector.broadcast %55 : i32 to vector<1x224xi32>
    %68 = arith.addi %57, %67 : vector<1x224xi32>
    %69 = arith.select %66, %68, %57 : vector<1x224xi1>, vector<1x224xi32>
    %c14_i32 = arith.constant 14 : i32
    %70 = vector.broadcast %c14_i32 : i32 to vector<1x224xi32>
    %71 = arith.cmpi slt, %69, %70 : vector<1x224xi32>
    %cst_50 = arith.constant 0.000000e+00 : f32
    %72 = vector.shape_cast %71 : vector<1x224xi1> to vector<1x224xi1>
    %73 = vector.broadcast %72 : vector<1x224xi1> to vector<8x224xi1>
    %74 = vector.broadcast %cst_50 : f32 to vector<8x224xf32>
    %75 = arith.select %73, %52, %74 : vector<8x224xi1>, vector<8x224xf32>
    %cst_51 = arith.constant dense<0.000000e+00> : vector<8xf32>
    %76 = vector.multi_reduction <add>, %75, %cst_51 [1] : vector<8x224xf32> to vector<8xf32>
    %77 = vector.shape_cast %76 : vector<8xf32> to vector<8x1xf32>
    %cst_52 = arith.constant 0.00510204071 : f32
    %78 = vector.broadcast %cst_52 : f32 to vector<8x1xf32>
    %79 = arith.mulf %77, %78 : vector<8x1xf32>
    %80 = vector.broadcast %79 : vector<8x1xf32> to vector<8x224xf32>
    %81 = arith.subf %52, %80 : vector<8x224xf32>
    %cst_53 = arith.constant 0.000000e+00 : f32
    %82 = vector.shape_cast %71 : vector<1x224xi1> to vector<1x224xi1>
    %83 = vector.broadcast %82 : vector<1x224xi1> to vector<8x224xi1>
    %84 = vector.broadcast %cst_53 : f32 to vector<8x224xf32>
    %85 = arith.select %83, %81, %84 : vector<8x224xi1>, vector<8x224xf32>
    %86 = arith.mulf %85, %85 : vector<8x224xf32>
    %cst_54 = arith.constant dense<0.000000e+00> : vector<8xf32>
    %87 = vector.multi_reduction <add>, %86, %cst_54 [1] : vector<8x224xf32> to vector<8xf32>
    %88 = vector.shape_cast %87 : vector<8xf32> to vector<8x1xf32>
    %89 = vector.shape_cast %79 : vector<8x1xf32> to vector<1x8x1xf32>
    %c0_55 = arith.constant 0 : index
    %c0_56 = arith.constant 0 : index
    %c0_57 = arith.constant 0 : index
    %90 = vector.load %arg3[%c0_55, %c0_56, %c0_57] : memref<1x8x1xf32, #tpu.memory_space<vmem>>, vector<1x8x1xf32>
    tpu.vector_store %arg3[%c0_55, %c0_56, %c0_57], %89 {strides = array<i32>} : memref<1x8x1xf32, #tpu.memory_space<vmem>>, vector<1x8x1xf32>,
    %91 = vector.shape_cast %88 : vector<8x1xf32> to vector<1x8x1xf32>
    %c0_58 = arith.constant 0 : index
    %c0_59 = arith.constant 0 : index
    %c0_60 = arith.constant 0 : index
    %92 = vector.load %arg4[%c0_58, %c0_59, %c0_60] : memref<1x8x1xf32, #tpu.memory_space<vmem>>, vector<1x8x1xf32>
    tpu.vector_store %arg4[%c0_58, %c0_59, %c0_60], %91 {strides = array<i32>} : memref<1x8x1xf32, #tpu.memory_space<vmem>>, vector<1x8x1xf32>,
    return
  }
  func.func @transform_0(%arg0: i32) -> (i32, i32, i32) {
    %c0_i32 = arith.constant 0 : i32
    %c0_i32_0 = arith.constant 0 : i32
    %c0_i32_1 = arith.constant 0 : i32
    return %arg0, %c0_i32, %c0_i32_0 : i32, i32, i32
  }
  func.func @transform_1(%arg0: i32) -> (i32, i32, i32) {
    %c0_i32 = arith.constant 0 : i32
    %c0_i32_0 = arith.constant 0 : i32
    %c0_i32_1 = arith.constant 0 : i32
    %c0_i32_2 = arith.constant 0 : i32
    return %c0_i32, %c0_i32_0, %c0_i32_1 : i32, i32, i32
  }
  func.func @transform_2(%arg0: i32) -> (i32, i32, i32) {
    %c0_i32 = arith.constant 0 : i32
    %c0_i32_0 = arith.constant 0 : i32
    %c0_i32_1 = arith.constant 0 : i32
    return %arg0, %c0_i32, %c0_i32_0 : i32, i32, i32
  }
  func.func @transform_3(%arg0: i32) -> (i32, i32, i32) {
    %c0_i32 = arith.constant 0 : i32
    %c0_i32_0 = arith.constant 0 : i32
    %c0_i32_1 = arith.constant 0 : i32
    return %arg0, %c0_i32, %c0_i32_0 : i32, i32, i32
  }
}

</mosaic_0001>

<bundles_post_ra>
// kernel: tpu_custom_call.1
= control target key start
LH: loop header
LB: loop body
LE: loop exit
PB: predicated region body
PF: predicated region fallthrough
CT: control target
= control target key end

     0   :  { %s987_s12 = smov 0   ;;  %s1099_s0 = inlined_call_operand.vmem [shape: f32[2,4,384], index: 0, kind: input, shape index: {}]   ;;  %s1100_s1 = inlined_call_operand.vmem [shape: f32[9,8,4], index: 1, kind: input, shape index: {}]   ;;  %s1101_s2 = inlined_call_operand.vmem [shape: f32[2,8,1], index: 2, kind: output, shape index: {0}]   ;;  %s1102_s3 = inlined_call_operand.vmem [shape: f32[2,8,1], index: 3, kind: output, shape index: {1}]  }
   0x1 LB: > { %s880_s13 = sadd.s32 4294967295, %s957_s12   ;;  %p884_p0 = scmp.ge.s32.totalorder %s957_s12, 1  ;;  %s957_s12 = sphi %s987_s12, %s14_s12  }
   0x2   : > { %p140_p1 = scmp.lt.s32.totalorder %s957_s12, 3 }
   0x4   : > { %p141_p2 = pnand %p884_p0, %p140_p1 }
   0x5   : > { %p167_p3 = scmp.lt.s32.totalorder (!%p141_p2), %s880_s13, 1  ;;  %s959_s18 = smov (!%p141_p2), 127  }
   0x6   : > { %144 = sbr.rel (%p141_p2) target bundleno = 580 (0x244), region = 28  ;;  %s960_s19 = smov (!%p141_p2), 95  }
   0x7   : > { %s961_s20 = smov (!%p141_p2), 126   ;;  %s962_s21 = smov (!%p141_p2), 112  }
   0x8   : > { %s963_s22 = smov (!%p141_p2), 111   ;;  %s964_s23 = smov (!%p141_p2), 110  }
   0x9   : > { %s965_s24 = smov (!%p141_p2), 96   ;;  %s966_s25 = smov (!%p141_p2), 94  }
   0xb   : > { %s1108_s13 = smov (!%p167_p3, %s880_s13), 1  ;;  %vm198_vm0 = vcmask 1043456   ;;  %vm194_vm1 = vcmask 31744   ;;  %v180_v24 = vld [vmem:[%s1100_s1] sm:$0xff]  ;;  %vm192_vm2 = vcmask 1039360   ;;  %v888_v27 = vld [vmem:[%s1100_s1 + $0x8] sm:$0xff] }
   0xc   : > { %s934_s14 = smul.u32 12, %s1108_s13  ;;  %vm366_vm3 = vcmask 916480   ;;  %v902_v31 = vld [vmem:[%s1100_s1 + $0x18] sm:$0xff]  ;;  %vm304_vm4 = vcmask 1031168   ;;  %v897_v34 = vld [vmem:[%s1100_s1 + $0x10] sm:$0xff]  ;;  %vm428_vm5 = vcmask 908288  }
   0xd   : > { %v907_v37 = vld [vmem:[%s1100_s1 + $0x20] sm:$0xff]  ;;  %vm490_vm6 = vcmask 900096   ;;  %v912_v42 = vld [vmem:[%s1100_s1 + $0x28] sm:$0xff]  ;;  %vm552_vm7 = vcmask 785408   ;;  %v917_v45 = vld [vmem:[%s1100_s1 + $0x30] sm:$0xff]  ;;  %vm621_vm8 = vcmask 777216  }
   0xe   : > { %s171_s17 = scalar_lea.vmem %s1099_s0, %s934_s14  ;;  %v922_v51 = vld [vmem:[%s1100_s1 + $0x38] sm:$0xff]  ;;  %vm691_vm9 = vcmask 769024   ;;  %v927_v57 = vld [vmem:[%s1100_s1 + $0x40] sm:$0xff]  ;;  %vm793_vm12 = vcmask 7168  }
   0xf   : > { %v181_v0 = vld [vmem:[%s171_s17] sm:$0xff]  ;;  %v606_v1 = vld [vmem:[%s171_s17 + $0x8] sm:$0xf] }
  0x10   : > { %185 = vst [vmem:[#allocation1] ss:$2 sm:$0xff] %v181_v0  ;;  %v676_v7 = vld [vmem:[%s171_s17 + $0x8] sm:$0xf] }
  0x11   : > { %611 = vst [vmem:[#allocation1 + $0x10] ss:$2 sm:$0xff] %v606_v1 }
  0x17   : > { %v186_v2 = vld.sshfl [vmem:[#allocation1] sm:$0xff pattern:$0x75316420]  ;;  %v187_v3 = vld.sshfl [vmem:[#allocation1 + $0x8] sm:$0xff pattern:$0x75316420] }
  0x18   : > { %188 = vrot.lane.b32.xlu0 %v186_v2, %s959_s18  ;;  %243 = vst [vmem:[#allocation1] ss:$2 sm:$0xff] %v181_v0  ;;  %v614_v6 = vld.sshfl [vmem:[#allocation1 + $0x10] sm:$0xff pattern:$0x75316420] }
  0x19   : > { %619 = vrot.lane.b32.xlu2 %v614_v6, %s960_s19  ;;  %681 = vst [vmem:[#allocation1 + $0x10] ss:$2 sm:$0xff] %v676_v7 }
  0x1f   : > { %v244_v4 = vld.sshfl [vmem:[#allocation1] sm:$0xff pattern:$0x75316420]  ;;  %v245_v5 = vld.sshfl [vmem:[#allocation1 + $0x8] sm:$0xff pattern:$0x75316420] }
  0x20   : > { %297 = vst [vmem:[#allocation1] ss:$2 sm:$0xff] %v181_v0  ;;  %190 = vrot.lane.b32.xlu0 %v187_v3, %s959_s18  ;;  %v684_v20 = vld.sshfl [vmem:[#allocation1 + $0x10] sm:$0xff pattern:$0x75316420]  ;;  %895 = vmatpush.msk.msra.mxu3 %vm198_vm0, %v245_v5 }
  0x21   : > { %893 = vmatpush.msk.msra.mxu2 %vm198_vm0, %v244_v4  ;;  %896 = vmatmul.msk.f32.vlgmr.msra.gmra.mxu3 %vm194_vm1, %v180_v24 }
  0x22   : > { %894 = vmatmul.msk.f32.vlgmr.msra.gmra.mxu2 %vm194_vm1, %v180_v24 }
  0x27   : > { %v298_v8 = vld.sshfl [vmem:[#allocation1] sm:$0xff pattern:$0x75316420]  ;;  %v299_v9 = vld.sshfl [vmem:[#allocation1 + $0x8] sm:$0xff pattern:$0x75316420] }
  0x28   : > { %300 = vrot.lane.b32.xlu1 %v298_v8, %s961_s20  ;;  %359 = vst [vmem:[#allocation1] ss:$2 sm:$0xff] %v181_v0 }
  0x2f   : > { %v360_v10 = vld.sshfl [vmem:[#allocation1] sm:$0xff pattern:$0x75316420]  ;;  %v361_v11 = vld.sshfl [vmem:[#allocation1 + $0x8] sm:$0xff pattern:$0x75316420] }
  0x30   : > { %302 = vrot.lane.b32.xlu1 %v299_v9, %s961_s20  ;;  %421 = vst [vmem:[#allocation1] ss:$2 sm:$0xff] %v181_v0  ;;  %362 = vrot.lane.b32.xlu2 %v360_v10, %s962_s21  ;;  %v743_v10 = vlaneseq }
  0x37   : > { %v422_v12 = vld.sshfl [vmem:[#allocation1] sm:$0xff pattern:$0x75316420]  ;;  %v423_v13 = vld.sshfl [vmem:[#allocation1 + $0x8] sm:$0xff pattern:$0x75316420] }
  0x38   : > { %424 = vrot.lane.b32.xlu0 %v422_v12, %s963_s22  ;;  %426 = vrot.lane.b32.xlu1 %v423_v13, %s963_s22  ;;  %483 = vst [vmem:[#allocation1] ss:$2 sm:$0xff] %v181_v0  ;;  %v744_v13 = vand.u32 127, %v743_v10 }
  0x39   : > { %364 = vrot.lane.b32.xlu2 %v361_v11, %s962_s21 }
  0x3a   : > { %v750_v24 = vand.u32 15, %v744_v13 }
  0x3c   : > { %vm1075_vm11 = vcmp.lt.s32.totalorder %v750_v24, 14 }
  0x3f   : > { %v485_v14 = vld.sshfl [vmem:[#allocation1 + $0x8] sm:$0xff pattern:$0x75316420]  ;;  %v484_v15 = vld.sshfl [vmem:[#allocation1] sm:$0xff pattern:$0x75316420] }
  0x40   : > { %488 = vrot.lane.b32.xlu0 %v485_v14, %s964_s23  ;;  %545 = vst [vmem:[#allocation1] ss:$2 sm:$0xff] %v181_v0 }
  0x41   : > { %486 = vrot.lane.b32.xlu2 %v484_v15, %s964_s23 }
  0x47   : > { %v547_v16 = vld.sshfl [vmem:[#allocation1 + $0x8] sm:$0xff pattern:$0x75316420]  ;;  %v546_v17 = vld.sshfl [vmem:[#allocation1] sm:$0xff pattern:$0x75316420] }
  0x48   : > { %550 = vrot.lane.b32.xlu1 %v547_v16, %s965_s24  ;;  %548 = vrot.lane.b32.xlu0 %v546_v17, %s965_s24  ;;  %609 = vst [vmem:[#allocation1] ss:$2 sm:$0xff] %v181_v0 }
  0x4f   : > { %v613_v18 = vld.sshfl [vmem:[#allocation1 + $0x8] sm:$0xff pattern:$0x75316420]  ;;  %v612_v19 = vld.sshfl [vmem:[#allocation1] sm:$0xff pattern:$0x75316420] }
  0x50   : > { %617 = vrot.lane.b32.xlu1 %v613_v18, %s960_s19  ;;  %679 = vst [vmem:[#allocation1] ss:$2 sm:$0xff] %v181_v0  ;;  %615 = vrot.lane.b32.xlu2 %v612_v19, %s960_s19  ;;  %s886_s19 = sshll.u32 %s1108_s13, 3 }
  0x51   : > { %s175_s22 = scalar_lea.vmem %s1101_s2, %s886_s19  ;;  %s179_s24 = scalar_lea.vmem %s1102_s3, %s886_s19 }
  0x57   : > { %v683_v21 = vld.sshfl [vmem:[#allocation1 + $0x8] sm:$0xff pattern:$0x75316420]  ;;  %v682_v22 = vld.sshfl [vmem:[#allocation1] sm:$0xff pattern:$0x75316420] }
  0x58   : > { %689 = vrot.lane.b32.xlu1 %v684_v20, %s966_s25  ;;  %687 = vrot.lane.b32.xlu0 %v683_v21, %s966_s25  ;;  %v745_v20 = vadd.s32 128, %v744_v13 }
  0x59   : > { %685 = vrot.lane.b32.xlu2 %v682_v22, %s966_s25 }
  0x73   : > { %v1004_v23 = vpop.permute.xlu2 %619 }
  0x8a   : > { %v189_v25 = vpop.permute.xlu0 %188  ;;  %v363_v26 = vpop.permute.xlu2 %362 }
  0x92   : > { %v191_v28 = vpop.permute.xlu0 %190 }
  0x93   : > { %v193_v29 = vsel %vm192_vm2, %v189_v25, %v191_v28  ;;  %891 = vmatpush.msk.msra.mxu1 %vm198_vm0, %v191_v28  ;;  %v365_v30 = vpop.permute.xlu2 %364 }
  0x94   : > { %889 = vmatpush.msk.msra.mxu0 %vm198_vm0, %v193_v29  ;;  %892 = vmatmul.msk.f32.vlgmr.msra.gmra.mxu1 %vm194_vm1, %v888_v27  ;;  %v367_v32 = vsel %vm366_vm3, %v363_v26, %v365_v30 }
  0x95   : > { %890 = vmatmul.msk.f32.vlgmr.msra.gmra.mxu0 %vm194_vm1, %v888_v27  ;;  %903 = vmatpush.msk.msrb.mxu2 %vm198_vm0, %v367_v32 }
  0x96   : > { %905 = vmatpush.msk.msrb.mxu3 %vm198_vm0, %v365_v30  ;;  %904 = vmatmul.msk.f32.vlgmr.msrb.gmra.mxu2 %vm194_vm1, %v902_v31 }
  0x97   : > { %906 = vmatmul.msk.f32.vlgmr.msrb.gmra.mxu3 %vm194_vm1, %v902_v31 }
  0x9a   : > { %v301_v33 = vpop.permute.xlu1 %300 }
  0x9b   : > { %v487_v41 = vpop.permute.xlu2 %486 }
  0xa2   : > { %v303_v35 = vpop.permute.xlu1 %302 }
  0xa3   : > { %v305_v36 = vsel %vm304_vm4, %v301_v33, %v303_v35  ;;  %900 = vmatpush.msk.msrb.mxu1 %vm198_vm0, %v303_v35 }
  0xa4   : > { %898 = vmatpush.msk.msrb.mxu0 %vm198_vm0, %v305_v36  ;;  %901 = vmatmul.msk.f32.vlgmr.msrb.gmra.mxu1 %vm194_vm1, %v897_v34  ;;  %v290_v62 = vpop.f32.mrf.mxu3 }
  0xa5   : > { %899 = vmatmul.msk.f32.vlgmr.msrb.gmra.mxu0 %vm194_vm1, %v897_v34  ;;  %v270_v63 = vpop.f32.mrf.mxu2 }
  0xaa   : > { %v425_v38 = vpop.permute.xlu0 %424  ;;  %v427_v39 = vpop.permute.xlu1 %426 }
  0xab   : > { %v429_v40 = vsel %vm428_vm5, %v425_v38, %v427_v39  ;;  %910 = vmatpush.msk.msra.mxu1 %vm198_vm0, %v427_v39  ;;  %v616_v49 = vpop.permute.xlu2 %615 }
  0xac   : > { %908 = vmatpush.msk.msra.mxu0 %vm198_vm0, %v429_v40  ;;  %911 = vmatmul.msk.f32.vlgmr.msra.gmra.mxu1 %vm194_vm1, %v907_v37 }
  0xad   : > { %909 = vmatmul.msk.f32.vlgmr.msra.gmra.mxu0 %vm194_vm1, %v907_v37 }
  0xb2   : > { %v489_v43 = vpop.permute.xlu0 %488 }
  0xb3   : > { %v491_v44 = vsel %vm490_vm6, %v487_v41, %v489_v43  ;;  %915 = vmatpush.msk.msra.mxu3 %vm198_vm0, %v489_v43  ;;  %v686_v54 = vpop.permute.xlu2 %685 }
  0xb4   : > { %913 = vmatpush.msk.msra.mxu2 %vm198_vm0, %v491_v44  ;;  %916 = vmatmul.msk.f32.vlgmr.msra.gmra.mxu3 %vm194_vm1, %v912_v42 }
  0xb5   : > { %914 = vmatmul.msk.f32.vlgmr.msra.gmra.mxu2 %vm194_vm1, %v912_v42 }
  0xba   : > { %v551_v46 = vpop.permute.xlu1 %550  ;;  %v549_v47 = vpop.permute.xlu0 %548 }
  0xbb   : > { %v553_v48 = vsel %vm552_vm7, %v549_v47, %v551_v46  ;;  %920 = vmatpush.msk.msrb.mxu1 %vm198_vm0, %v551_v46 }
  0xbc   : > { %918 = vmatpush.msk.msrb.mxu0 %vm198_vm0, %v553_v48  ;;  %921 = vmatmul.msk.f32.vlgmr.msrb.gmra.mxu1 %vm194_vm1, %v917_v45 }
  0xbd   : > { %919 = vmatmul.msk.f32.vlgmr.msrb.gmra.mxu0 %vm194_vm1, %v917_v45 }
  0xc2   : > { %v618_v50 = vpop.permute.xlu1 %617 }
  0xc3   : > { %v623_v52 = vsel %vm621_vm8, %v618_v50, %v1004_v23  ;;  %v622_v53 = vsel %vm621_vm8, %v616_v49, %v618_v50  ;;  %v757_v23 = vand.u32 15, %v745_v20 }
  0xc4   : > { %923 = vmatpush.msk.msrb.mxu2 %vm198_vm0, %v622_v53  ;;  %925 = vmatpush.msk.msrb.mxu3 %vm198_vm0, %v623_v52 }
  0xc5   : > { %924 = vmatmul.msk.f32.vlgmr.msrb.gmra.mxu2 %vm194_vm1, %v922_v51  ;;  %926 = vmatmul.msk.f32.vlgmr.msrb.gmra.mxu3 %vm194_vm1, %v922_v51  ;;  %vm1071_vm10 = vcmp.lt.s32.totalorder %v757_v23, 14 }
  0xca   : > { %v690_v55 = vpop.permute.xlu1 %689  ;;  %v688_v56 = vpop.permute.xlu0 %687 }
  0xcb   : > { %v693_v58 = vsel %vm691_vm9, %v688_v56, %v690_v55  ;;  %v692_v59 = vsel %vm691_vm9, %v686_v54, %v688_v56 }
  0xcc   : > { %928 = vmatpush.msk.msra.mxu0 %vm198_vm0, %v692_v59  ;;  %930 = vmatpush.msk.msra.mxu1 %vm198_vm0, %v693_v58 }
  0xcd   : > { %929 = vmatmul.msk.f32.vlgmr.msra.gmra.mxu0 %vm194_vm1, %v927_v57  ;;  %931 = vmatmul.msk.f32.vlgmr.msra.gmra.mxu1 %vm194_vm1, %v927_v57 }
 0x111   : > { %v240_v60 = vpop.f32.mrf.mxu1 }
 0x112   : > { %v220_v61 = vpop.f32.mrf.mxu0  ;;  %v291_v2 = vadd.f32 %v290_v62, %v240_v60 }
 0x113   : > { %v271_v3 = vadd.f32 %v270_v63, %v220_v61 }
 0x119   : > { %v392_v5 = vpop.f32.mrf.mxu2 }
 0x11a   : > { %v412_v4 = vpop.f32.mrf.mxu3 }
 0x121   : > { %v350_v0 = vpop.f32.mrf.mxu1 }
 0x122   : > { %v330_v1 = vpop.f32.mrf.mxu0  ;;  %v354_v8 = vadd.f32 %v350_v0, %v291_v2 }
 0x123   : > { %v353_v9 = vadd.f32 %v330_v1, %v271_v3 }
 0x124   : > { %v416_v11 = vadd.f32 %v412_v4, %v354_v8 }
 0x125   : > { %v415_v12 = vadd.f32 %v392_v5, %v353_v9 }
 0x129   : > { %v474_v6 = vpop.f32.mrf.mxu1 }
 0x12a   : > { %v454_v7 = vpop.f32.mrf.mxu0  ;;  %v478_v16 = vadd.f32 %v474_v6, %v416_v11 }
 0x12b   : > { %v477_v17 = vadd.f32 %v454_v7, %v415_v12 }
 0x137   : > { %v536_v14 = vpop.f32.mrf.mxu3 }
 0x138   : > { %v516_v15 = vpop.f32.mrf.mxu2  ;;  %v540_v21 = vadd.f32 %v536_v14, %v478_v16 }
 0x139   : > { %v598_v18 = vpop.f32.mrf.mxu1  ;;  %v539_v22 = vadd.f32 %v516_v15, %v477_v17 }
 0x13a   : > { %v578_v19 = vpop.f32.mrf.mxu0  ;;  %v602_v25 = vadd.f32 %v598_v18, %v540_v21 }
 0x13b   : > { %v601_v26 = vadd.f32 %v578_v19, %v539_v22 }
 0x148   : > { %v648_v27 = vpop.f32.mrf.mxu2  ;;  %v668_v28 = vpop.f32.mrf.mxu3 }
 0x149   : > { %v671_v29 = vadd.f32 %v648_v27, %v601_v26  ;;  %v672_v30 = vadd.f32 %v668_v28, %v602_v25 }
 0x14a   : > { %v718_v31 = vpop.f32.mrf.mxu0  ;;  %v738_v32 = vpop.f32.mrf.mxu1 }
 0x14b   : > { %v741_v35 = vadd.f32 %v718_v31, %v671_v29  ;;  %v742_v36 = vadd.f32 %v738_v32, %v672_v30 }
 0x14d   : > { %v777_v37 = vsel %vm1071_vm10, %v742_v36, 0.0  ;;  %v776_v38 = vsel %vm1075_vm11, %v741_v35, 0.0 }
 0x14e   : > { %v778_v39 = vsel %vm552_vm7, %v777_v37, 0.0 }
 0x14f   : > { %v779_v40 = vadd.f32 %v778_v39, %v776_v38 }
 0x151   : > { %780 = vadd.xlane.f32.xlu0 %v779_v40 }
 0x1c4   : > { %v781_v41 = vpop.xlane.xlu0 %780 }
 0x1c5   : > { %v782_v42 = vmul.f32 0.0051020407, %v781_v41 }
 0x1c7   : > { %v783_v43 = vsub.f32 %v741_v35, %v782_v42  ;;  %v784_v44 = vsub.f32 %v742_v36, %v782_v42  ;;  %794 = vst.msk [vmem:[%s175_s22] sm:$0xff] %vm793_vm12, %v782_v42 }
 0x1c9   : > { %v785_v45 = vsel %vm1075_vm11, %v783_v43, 0.0  ;;  %v786_v46 = vsel %vm1071_vm10, %v784_v44, 0.0 }
 0x1ca   : > { %v787_v47 = vmul.f32 %v785_v45, %v785_v45  ;;  %v788_v48 = vmul.f32 %v786_v46, %v786_v46 }
 0x1cc   : > { %v789_v49 = vsel %vm552_vm7, %v788_v48, 0.0 }
 0x1cd   : > { %v790_v50 = vadd.f32 %v789_v49, %v787_v47 }
 0x1cf   : > { %791 = vadd.xlane.f32.xlu1 %v790_v50 }
 0x242   : > { %v792_v51 = vpop.xlane.xlu1 %791 }
 0x243   : > { %795 = vst.msk [vmem:[%s179_s24] sm:$0xff] %vm793_vm12, %v792_v51 }
 0x244 PF: > { %s14_s12 = sadd.s32 1, %s957_s12  }
 0x245   : > { %p11_p4 = scmp.ge.s32.totalorder %s14_s12, 4  }
 0x247   :  { %13 = sbr.rel (!%p11_p4) target bundleno = 1 (0x1), region = 80 }

</bundles_post_ra>
